<compile_context>
chip_gen: v6e
topology: v6e:2x2x1
jax: 0.10.0
libtpu: 0.0.40
codegen_flags: <defaults>
</compile_context>

<pallas_src>
import functools

import jax
import jax.numpy as jnp
import numpy as np
from jax.experimental import pallas as pl
from jax.experimental.pallas import tpu as pltpu


def _round_up(x, m):
    return (x + m - 1) // m * m


def tucker_kernel(h_ref, r_ref, w_ref, e_ref, bias_ref,
                  bn0s_ref, bn0b_ref, bn1s_ref, bn1b_ref, alpha_ref,
                  out_ref, t_ref, *, relation_dim):
    # --- Tucker core: computed once per batch tile (first entity tile), cached in VMEM ---
    @pl.when(pl.program_id(1) == 0)
    def _():
        h = h_ref[...] * bn0s_ref[...] + bn0b_ref[...]            # BN0 (eval), f32
        hb = h.astype(jnp.bfloat16)
        r = r_ref[...]                                            # (TB, dr) f32
        # t[b, j] = sum_k r[b, k] * (h_bn[b, :] @ W[k])  ==  bmm(h_bn, r @ W) of the reference
        acc = r[:, 0:1] * jnp.dot(hb, w_ref[0], preferred_element_type=jnp.float32)
        for k in range(1, relation_dim):
            acc = acc + r[:, k:k + 1] * jnp.dot(
                hb, w_ref[k], preferred_element_type=jnp.float32)
        t = acc * bn1s_ref[...] + bn1b_ref[...]                   # BN1 (eval)
        alpha = alpha_ref[0, 0]
        t = jnp.where(t >= 0, t, alpha * t)                       # PReLU
        t_ref[...] = t.astype(jnp.bfloat16)

    # --- Score this entity tile: contract de on both operands (E consumed untransposed) ---
    scores = jax.lax.dot_general(
        t_ref[...], e_ref[...],
        dimension_numbers=(((1,), (1,)), ((), ())),
        preferred_element_type=jnp.float32)                        # (TB, TN)
    out_ref[...] = jax.nn.sigmoid(scores + bias_ref[...])


def tucker_forward(h_idx, r_idx, params, *, tb_max=128, tn_max=512):
    E_w, R_w, W, b = params["E"], params["R"], params["W"], params["b"]
    ne, de = E_w.shape
    nr, dr = R_w.shape
    B = h_idx.shape[0]
    eps = 1e-5

    # --- glue: embedding gathers (cheap, stays in XLA) ---
    h = E_w[h_idx].astype(jnp.float32)
    r = R_w[r_idx].astype(jnp.float32)

    # --- padding: lane-dense output (ne -> mult of 128) and >=8 batch rows ---
    if B <= tb_max:
        B_pad = _round_up(max(B, 8), 8)
        TB = B_pad
    else:
        B_pad = _round_up(B, tb_max)
        TB = tb_max
    if ne <= tn_max:
        ne_pad = _round_up(ne, 128)
        TN = ne_pad
    else:
        ne_pad = _round_up(ne, tn_max)
        TN = tn_max

    h = jnp.pad(h, ((0, B_pad - B), (0, 0)))
    r = jnp.pad(r, ((0, B_pad - B), (0, 0)))

    # Weight-side preprocessing (bf16 casts, zero padding). In a serving path these would be
    # done once and cached; no HBM-level transpose of E is needed.
    W_bf = W.astype(jnp.bfloat16)                                              # (dr, de, de)
    E_bf = jnp.pad(E_w, ((0, ne_pad - ne), (0, 0))).astype(jnp.bfloat16)       # (ne_pad, de)
    bias = jnp.pad(b, (0, ne_pad - ne)).reshape(1, ne_pad).astype(jnp.float32)

    bn0_scale = (params["bn0_w"] / jnp.sqrt(params["bn0_var"] + eps)).reshape(1, de)
    bn0_shift = (params["bn0_b"] - params["bn0_mean"] * bn0_scale[0]).reshape(1, de)
    bn1_scale = (params["bn1_w"] / jnp.sqrt(params["bn1_var"] + eps)).reshape(1, de)
    bn1_shift = (params["bn1_b"] - params["bn1_mean"] * bn1_scale[0]).reshape(1, de)
    alpha = params["prelu_a"].reshape(1, 1).astype(jnp.float32)

    # NOTE: Dropout layers (input_dropout, hidden_dropout1/2) are identity in eval mode.
    # TODO(synk): training-mode stochastic dropout / batch-stat BN are not implemented in-kernel.

    grid = (B_pad // TB, ne_pad // TN)
    kernel = functools.partial(tucker_kernel, relation_dim=dr)

    # VMEM budget: double-buffered streams + resident core tensor + t scratch (with margin).
    vmem_est = (2 * (TB * de * 4 + TB * dr * 4 + TN * de * 2 + TN * 4 + TB * TN * 4)
                + 2 * dr * de * de * 2 + TB * de * 2 + 8 * de * 4 + 4096)
    vmem_limit = int(min(max(2 * vmem_est, 4 << 20), 48 << 20))

    flops = 2 * B_pad * dr * de * de + 2 * B_pad * de * ne_pad
    bytes_accessed = int(h.size * 4 + r.size * 4 + W_bf.size * 2 + E_bf.size * 2
                         + bias.size * 4 + B_pad * ne_pad * 4)

    out = pl.pallas_call(
        kernel,
        grid_spec=pltpu.PrefetchScalarGridSpec(
            num_scalar_prefetch=0,
            grid=grid,
            in_specs=[
                pl.BlockSpec((TB, de), lambda i, j: (i, 0)),          # h   (batch-indexed)
                pl.BlockSpec((TB, dr), lambda i, j: (i, 0)),          # r   (batch-indexed)
                pl.BlockSpec((dr, de, de), lambda i, j: (0, 0, 0)),   # W   (resident)
                pl.BlockSpec((TN, de), lambda i, j: (j, 0)),          # E   (streamed tiles)
                pl.BlockSpec((1, TN), lambda i, j: (0, j)),           # bias
                pl.BlockSpec((1, de), lambda i, j: (0, 0)),           # bn0 scale
                pl.BlockSpec((1, de), lambda i, j: (0, 0)),           # bn0 shift
                pl.BlockSpec((1, de), lambda i, j: (0, 0)),           # bn1 scale
                pl.BlockSpec((1, de), lambda i, j: (0, 0)),           # bn1 shift
                pl.BlockSpec((1, 1), lambda i, j: (0, 0)),            # prelu alpha
            ],
            out_specs=pl.BlockSpec((TB, TN), lambda i, j: (i, j)),
            scratch_shapes=[pltpu.VMEM((TB, de), jnp.bfloat16)],      # cached t per batch tile
        ),
        out_shape=jax.ShapeDtypeStruct((B_pad, ne_pad), jnp.float32),
        compiler_params=pltpu.CompilerParams(
            dimension_semantics=("parallel", "arbitrary"),
            vmem_limit_bytes=vmem_limit),
        cost_estimate=pl.CostEstimate(
            flops=flops,
            transcendentals=B_pad * ne_pad,
            bytes_accessed=bytes_accessed),
    )(h, r, W_bf, E_bf, bias, bn0_scale, bn0_shift, bn1_scale, bn1_shift, alpha)

    return out[:B, :ne]


def tucker_reference(h_idx, r_idx, params):
    """Pure-JAX mirror of the PyTorch forward (eval mode), f32 throughout."""
    E_w, R_w, W, b = params["E"], params["R"], params["W"], params["b"]
    ne, de = E_w.shape
    nr, dr = R_w.shape
    eps = 1e-5

    h = E_w[h_idx]
    r = R_w[r_idx]
    h = (h - params["bn0_mean"]) / jnp.sqrt(params["bn0_var"] + eps) * params["bn0_w"] + params["bn0_b"]
    Wr = (r @ W.reshape(dr, de * de)).reshape(-1, de, de)
    t = jnp.einsum("bi,bij->bj", h, Wr)
    t = (t - params["bn1_mean"]) / jnp.sqrt(params["bn1_var"] + eps) * params["bn1_w"] + params["bn1_b"]
    t = jnp.where(t >= 0, t, params["prelu_a"][0] * t)
    x = t @ E_w.T + b[None, :]
    return jax.nn.sigmoid(x)


if __name__ == "__main__":
    num_entities, num_relations = 64, 12
    entity_dim, relation_dim = 32, 16
    batch = 4

    key = jax.random.PRNGKey(0)
    k_e, k_r, k_w, k_h, k_ri = jax.random.split(key, 5)

    # deterministic, in-script parameter init (shapes from the module's __init__)
    bound_e = float(np.sqrt(6.0 / entity_dim))      # kaiming_uniform_ on E.weight
    bound_r = float(np.sqrt(6.0 / relation_dim))    # kaiming_uniform_ on R.weight
    params = {
        "E": jax.random.uniform(k_e, (num_entities, entity_dim), jnp.float32, -bound_e, bound_e),
        "R": jax.random.uniform(k_r, (num_relations, relation_dim), jnp.float32, -bound_r, bound_r),
        "W": jax.random.uniform(k_w, (relation_dim, entity_dim, entity_dim), jnp.float32, -0.01, 0.01),
        "b": jnp.zeros((num_entities,), jnp.float32),
        # BatchNorm1d defaults (eval mode)
        "bn0_w": jnp.ones((entity_dim,), jnp.float32),
        "bn0_b": jnp.zeros((entity_dim,), jnp.float32),
        "bn0_mean": jnp.zeros((entity_dim,), jnp.float32),
        "bn0_var": jnp.ones((entity_dim,), jnp.float32),
        "bn1_w": jnp.ones((entity_dim,), jnp.float32),
        "bn1_b": jnp.zeros((entity_dim,), jnp.float32),
        "bn1_mean": jnp.zeros((entity_dim,), jnp.float32),
        "bn1_var": jnp.ones((entity_dim,), jnp.float32),
        # PReLU default
        "prelu_a": jnp.full((1,), 0.25, jnp.float32),
    }

    h_idx = jax.random.randint(k_h, (batch,), 0, num_entities)
    r_idx = jax.random.randint(k_ri, (batch,), 0, num_relations)

    out = tucker_forward(h_idx, r_idx, params)
    out = jax.block_until_ready(out)

    ref = tucker_reference(h_idx, r_idx, params)
    # bf16 MXU operands -> slightly looser tolerance than a pure-f32 pipeline.
    np.testing.assert_allclose(np.asarray(out), np.asarray(ref), rtol=2e-2, atol=2e-2)
    assert out.shape == (batch, num_entities)

    print("KERNEL_OK")
</pallas_src>

<mosaic_0001>
module attributes {stable_mosaic.version = 11 : i64} {
  func.func @tucker_kernel(%arg0: i32, %arg1: i32, %arg2: memref<8x32xf32, #tpu.memory_space<vmem>>, %arg3: memref<8x16xf32, #tpu.memory_space<vmem>>, %arg4: memref<16x32x32xbf16, #tpu.memory_space<vmem>>, %arg5: memref<128x32xbf16, #tpu.memory_space<vmem>>, %arg6: memref<1x128xf32, #tpu.memory_space<vmem>>, %arg7: memref<1x32xf32, #tpu.memory_space<vmem>>, %arg8: memref<1x32xf32, #tpu.memory_space<vmem>>, %arg9: memref<1x32xf32, #tpu.memory_space<vmem>>, %arg10: memref<1x32xf32, #tpu.memory_space<vmem>>, %arg11: memref<1x1xf32, #tpu.memory_space<vmem>>, %arg12: memref<8x128xf32, #tpu.memory_space<vmem>>, %arg13: memref<8x32xbf16, #tpu.memory_space<vmem>>) attributes {dimension_semantics = [#tpu.dimension_semantics<parallel>, #tpu.dimension_semantics<arbitrary>], iteration_bounds = array<i64: 1, 1>, scalar_prefetch = 0 : i64, scratch_operands = 1 : i64, tpu.core_type = #tpu.core_type<tc>, window_params = [{transform_indices = @transform_0, window_bounds = array<i64: 8, 32>}, {transform_indices = @transform_1, window_bounds = array<i64: 8, 16>}, {pipeline_mode = #tpu.pipeline_mode<synchronous>, transform_indices = @transform_2, window_bounds = array<i64: 16, 32, 32>}, {transform_indices = @transform_3, window_bounds = array<i64: 128, 32>}, {transform_indices = @transform_4, window_bounds = array<i64: 1, 128>}, {pipeline_mode = #tpu.pipeline_mode<synchronous>, transform_indices = @transform_5, window_bounds = array<i64: 1, 32>}, {pipeline_mode = #tpu.pipeline_mode<synchronous>, transform_indices = @transform_6, window_bounds = array<i64: 1, 32>}, {pipeline_mode = #tpu.pipeline_mode<synchronous>, transform_indices = @transform_7, window_bounds = array<i64: 1, 32>}, {pipeline_mode = #tpu.pipeline_mode<synchronous>, transform_indices = @transform_8, window_bounds = array<i64: 1, 32>}, {pipeline_mode = #tpu.pipeline_mode<synchronous>, transform_indices = @transform_9, window_bounds = array<i64: 1, 1>}, {transform_indices = @transform_10, window_bounds = array<i64: 8, 128>}]} {
    %c0_i32 = arith.constant 0 : i32
    %0 = arith.cmpi eq, %arg1, %c0_i32 : i32
    %1 = arith.extui %0 : i1 to i32
    %c0_i32_0 = arith.constant 0 : i32
    %2 = arith.cmpi ne, %1, %c0_i32_0 : i32
    scf.if %2 {
      %c0_9 = arith.constant 0 : index
      %c0_10 = arith.constant 0 : index
      %15 = vector.load %arg2[%c0_9, %c0_10] : memref<8x32xf32, #tpu.memory_space<vmem>>, vector<8x32xf32>
      %c0_11 = arith.constant 0 : index
      %c0_12 = arith.constant 0 : index
      %16 = vector.load %arg7[%c0_11, %c0_12] : memref<1x32xf32, #tpu.memory_space<vmem>>, vector<1x32xf32>
      %17 = vector.broadcast %16 : vector<1x32xf32> to vector<8x32xf32>
      %18 = arith.mulf %15, %17 : vector<8x32xf32>
      %c0_13 = arith.constant 0 : index
      %c0_14 = arith.constant 0 : index
      %19 = vector.load %arg8[%c0_13, %c0_14] : memref<1x32xf32, #tpu.memory_space<vmem>>, vector<1x32xf32>
      %20 = vector.broadcast %19 : vector<1x32xf32> to vector<8x32xf32>
      %21 = arith.addf %18, %20 : vector<8x32xf32>
      %22 = arith.truncf %21 : vector<8x32xf32> to vector<8x32xbf16>
      %c0_15 = arith.constant 0 : index
      %c0_16 = arith.constant 0 : index
      %23 = vector.load %arg3[%c0_15, %c0_16] : memref<8x16xf32, #tpu.memory_space<vmem>>, vector<8x16xf32>
      %24 = vector.extract_strided_slice %23 {offsets = [0, 0], sizes = [8, 1], strides = [1, 1]} : vector<8x16xf32> to vector<8x1xf32>
      %c0_17 = arith.constant 0 : index
      %c0_18 = arith.constant 0 : index
      %c0_19 = arith.constant 0 : index
      %25 = vector.load %arg4[%c0_17, %c0_18, %c0_19] : memref<16x32x32xbf16, #tpu.memory_space<vmem>>, vector<1x32x32xbf16>
      %26 = vector.shape_cast %25 : vector<1x32x32xbf16> to vector<32x32xbf16>
      %cst_20 = arith.constant dense<0.000000e+00> : vector<8x32xf32>
      %27 = tpu.matmul %22, %26, %cst_20 {dimension_numbers = #tpu.dot_dimension_numbers<[1], [0], [0], [1], [0, 0, 1, 1], [], []>} : vector<8x32xbf16>, vector<32x32xbf16>, vector<8x32xf32> -> vector<8x32xf32>
      %28 = vector.broadcast %24 : vector<8x1xf32> to vector<8x32xf32>
      %29 = arith.mulf %28, %27 : vector<8x32xf32>
      %30 = vector.extract_strided_slice %23 {offsets = [0, 1], sizes = [8, 1], strides = [1, 1]} : vector<8x16xf32> to vector<8x1xf32>
      %c1 = arith.constant 1 : index
      %c0_21 = arith.constant 0 : index
      %c0_22 = arith.constant 0 : index
      %31 = vector.load %arg4[%c1, %c0_21, %c0_22] : memref<16x32x32xbf16, #tpu.memory_space<vmem>>, vector<1x32x32xbf16>
      %32 = vector.shape_cast %31 : vector<1x32x32xbf16> to vector<32x32xbf16>
      %cst_23 = arith.constant dense<0.000000e+00> : vector<8x32xf32>
      %33 = tpu.matmul %22, %32, %cst_23 {dimension_numbers = #tpu.dot_dimension_numbers<[1], [0], [0], [1], [0, 0, 1, 1], [], []>} : vector<8x32xbf16>, vector<32x32xbf16>, vector<8x32xf32> -> vector<8x32xf32>
      %34 = vector.broadcast %30 : vector<8x1xf32> to vector<8x32xf32>
      %35 = arith.mulf %34, %33 : vector<8x32xf32>
      %36 = arith.addf %29, %35 : vector<8x32xf32>
      %37 = vector.extract_strided_slice %23 {offsets = [0, 2], sizes = [8, 1], strides = [1, 1]} : vector<8x16xf32> to vector<8x1xf32>
      %c2 = arith.constant 2 : index
      %c0_24 = arith.constant 0 : index
      %c0_25 = arith.constant 0 : index
      %38 = vector.load %arg4[%c2, %c0_24, %c0_25] : memref<16x32x32xbf16, #tpu.memory_space<vmem>>, vector<1x32x32xbf16>
      %39 = vector.shape_cast %38 : vector<1x32x32xbf16> to vector<32x32xbf16>
      %cst_26 = arith.constant dense<0.000000e+00> : vector<8x32xf32>
      %40 = tpu.matmul %22, %39, %cst_26 {dimension_numbers = #tpu.dot_dimension_numbers<[1], [0], [0], [1], [0, 0, 1, 1], [], []>} : vector<8x32xbf16>, vector<32x32xbf16>, vector<8x32xf32> -> vector<8x32xf32>
      %41 = vector.broadcast %37 : vector<8x1xf32> to vector<8x32xf32>
      %42 = arith.mulf %41, %40 : vector<8x32xf32>
      %43 = arith.addf %36, %42 : vector<8x32xf32>
      %44 = vector.extract_strided_slice %23 {offsets = [0, 3], sizes = [8, 1], strides = [1, 1]} : vector<8x16xf32> to vector<8x1xf32>
      %c3 = arith.constant 3 : index
      %c0_27 = arith.constant 0 : index
      %c0_28 = arith.constant 0 : index
      %45 = vector.load %arg4[%c3, %c0_27, %c0_28] : memref<16x32x32xbf16, #tpu.memory_space<vmem>>, vector<1x32x32xbf16>
      %46 = vector.shape_cast %45 : vector<1x32x32xbf16> to vector<32x32xbf16>
      %cst_29 = arith.constant dense<0.000000e+00> : vector<8x32xf32>
      %47 = tpu.matmul %22, %46, %cst_29 {dimension_numbers = #tpu.dot_dimension_numbers<[1], [0], [0], [1], [0, 0, 1, 1], [], []>} : vector<8x32xbf16>, vector<32x32xbf16>, vector<8x32xf32> -> vector<8x32xf32>
      %48 = vector.broadcast %44 : vector<8x1xf32> to vector<8x32xf32>
      %49 = arith.mulf %48, %47 : vector<8x32xf32>
      %50 = arith.addf %43, %49 : vector<8x32xf32>
      %51 = vector.extract_strided_slice %23 {offsets = [0, 4], sizes = [8, 1], strides = [1, 1]} : vector<8x16xf32> to vector<8x1xf32>
      %c4 = arith.constant 4 : index
      %c0_30 = arith.constant 0 : index
      %c0_31 = arith.constant 0 : index
      %52 = vector.load %arg4[%c4, %c0_30, %c0_31] : memref<16x32x32xbf16, #tpu.memory_space<vmem>>, vector<1x32x32xbf16>
      %53 = vector.shape_cast %52 : vector<1x32x32xbf16> to vector<32x32xbf16>
      %cst_32 = arith.constant dense<0.000000e+00> : vector<8x32xf32>
      %54 = tpu.matmul %22, %53, %cst_32 {dimension_numbers = #tpu.dot_dimension_numbers<[1], [0], [0], [1], [0, 0, 1, 1], [], []>} : vector<8x32xbf16>, vector<32x32xbf16>, vector<8x32xf32> -> vector<8x32xf32>
      %55 = vector.broadcast %51 : vector<8x1xf32> to vector<8x32xf32>
      %56 = arith.mulf %55, %54 : vector<8x32xf32>
      %57 = arith.addf %50, %56 : vector<8x32xf32>
      %58 = vector.extract_strided_slice %23 {offsets = [0, 5], sizes = [8, 1], strides = [1, 1]} : vector<8x16xf32> to vector<8x1xf32>
      %c5 = arith.constant 5 : index
      %c0_33 = arith.constant 0 : index
      %c0_34 = arith.constant 0 : index
      %59 = vector.load %arg4[%c5, %c0_33, %c0_34] : memref<16x32x32xbf16, #tpu.memory_space<vmem>>, vector<1x32x32xbf16>
      %60 = vector.shape_cast %59 : vector<1x32x32xbf16> to vector<32x32xbf16>
      %cst_35 = arith.constant dense<0.000000e+00> : vector<8x32xf32>
      %61 = tpu.matmul %22, %60, %cst_35 {dimension_numbers = #tpu.dot_dimension_numbers<[1], [0], [0], [1], [0, 0, 1, 1], [], []>} : vector<8x32xbf16>, vector<32x32xbf16>, vector<8x32xf32> -> vector<8x32xf32>
      %62 = vector.broadcast %58 : vector<8x1xf32> to vector<8x32xf32>
      %63 = arith.mulf %62, %61 : vector<8x32xf32>
      %64 = arith.addf %57, %63 : vector<8x32xf32>
      %65 = vector.extract_strided_slice %23 {offsets = [0, 6], sizes = [8, 1], strides = [1, 1]} : vector<8x16xf32> to vector<8x1xf32>
      %c6 = arith.constant 6 : index
      %c0_36 = arith.constant 0 : index
      %c0_37 = arith.constant 0 : index
      %66 = vector.load %arg4[%c6, %c0_36, %c0_37] : memref<16x32x32xbf16, #tpu.memory_space<vmem>>, vector<1x32x32xbf16>
      %67 = vector.shape_cast %66 : vector<1x32x32xbf16> to vector<32x32xbf16>
      %cst_38 = arith.constant dense<0.000000e+00> : vector<8x32xf32>
      %68 = tpu.matmul %22, %67, %cst_38 {dimension_numbers = #tpu.dot_dimension_numbers<[1], [0], [0], [1], [0, 0, 1, 1], [], []>} : vector<8x32xbf16>, vector<32x32xbf16>, vector<8x32xf32> -> vector<8x32xf32>
      %69 = vector.broadcast %65 : vector<8x1xf32> to vector<8x32xf32>
      %70 = arith.mulf %69, %68 : vector<8x32xf32>
      %71 = arith.addf %64, %70 : vector<8x32xf32>
      %72 = vector.extract_strided_slice %23 {offsets = [0, 7], sizes = [8, 1], strides = [1, 1]} : vector<8x16xf32> to vector<8x1xf32>
      %c7 = arith.constant 7 : index
      %c0_39 = arith.constant 0 : index
      %c0_40 = arith.constant 0 : index
      %73 = vector.load %arg4[%c7, %c0_39, %c0_40] : memref<16x32x32xbf16, #tpu.memory_space<vmem>>, vector<1x32x32xbf16>
      %74 = vector.shape_cast %73 : vector<1x32x32xbf16> to vector<32x32xbf16>
      %cst_41 = arith.constant dense<0.000000e+00> : vector<8x32xf32>
      %75 = tpu.matmul %22, %74, %cst_41 {dimension_numbers = #tpu.dot_dimension_numbers<[1], [0], [0], [1], [0, 0, 1, 1], [], []>} : vector<8x32xbf16>, vector<32x32xbf16>, vector<8x32xf32> -> vector<8x32xf32>
      %76 = vector.broadcast %72 : vector<8x1xf32> to vector<8x32xf32>
      %77 = arith.mulf %76, %75 : vector<8x32xf32>
      %78 = arith.addf %71, %77 : vector<8x32xf32>
      %79 = vector.extract_strided_slice %23 {offsets = [0, 8], sizes = [8, 1], strides = [1, 1]} : vector<8x16xf32> to vector<8x1xf32>
      %c8 = arith.constant 8 : index
      %c0_42 = arith.constant 0 : index
      %c0_43 = arith.constant 0 : index
      %80 = vector.load %arg4[%c8, %c0_42, %c0_43] : memref<16x32x32xbf16, #tpu.memory_space<vmem>>, vector<1x32x32xbf16>
      %81 = vector.shape_cast %80 : vector<1x32x32xbf16> to vector<32x32xbf16>
      %cst_44 = arith.constant dense<0.000000e+00> : vector<8x32xf32>
      %82 = tpu.matmul %22, %81, %cst_44 {dimension_numbers = #tpu.dot_dimension_numbers<[1], [0], [0], [1], [0, 0, 1, 1], [], []>} : vector<8x32xbf16>, vector<32x32xbf16>, vector<8x32xf32> -> vector<8x32xf32>
      %83 = vector.broadcast %79 : vector<8x1xf32> to vector<8x32xf32>
      %84 = arith.mulf %83, %82 : vector<8x32xf32>
      %85 = arith.addf %78, %84 : vector<8x32xf32>
      %86 = vector.extract_strided_slice %23 {offsets = [0, 9], sizes = [8, 1], strides = [1, 1]} : vector<8x16xf32> to vector<8x1xf32>
      %c9 = arith.constant 9 : index
      %c0_45 = arith.constant 0 : index
      %c0_46 = arith.constant 0 : index
      %87 = vector.load %arg4[%c9, %c0_45, %c0_46] : memref<16x32x32xbf16, #tpu.memory_space<vmem>>, vector<1x32x32xbf16>
      %88 = vector.shape_cast %87 : vector<1x32x32xbf16> to vector<32x32xbf16>
      %cst_47 = arith.constant dense<0.000000e+00> : vector<8x32xf32>
      %89 = tpu.matmul %22, %88, %cst_47 {dimension_numbers = #tpu.dot_dimension_numbers<[1], [0], [0], [1], [0, 0, 1, 1], [], []>} : vector<8x32xbf16>, vector<32x32xbf16>, vector<8x32xf32> -> vector<8x32xf32>
      %90 = vector.broadcast %86 : vector<8x1xf32> to vector<8x32xf32>
      %91 = arith.mulf %90, %89 : vector<8x32xf32>
      %92 = arith.addf %85, %91 : vector<8x32xf32>
      %93 = vector.extract_strided_slice %23 {offsets = [0, 10], sizes = [8, 1], strides = [1, 1]} : vector<8x16xf32> to vector<8x1xf32>
      %c10 = arith.constant 10 : index
      %c0_48 = arith.constant 0 : index
      %c0_49 = arith.constant 0 : index
      %94 = vector.load %arg4[%c10, %c0_48, %c0_49] : memref<16x32x32xbf16, #tpu.memory_space<vmem>>, vector<1x32x32xbf16>
      %95 = vector.shape_cast %94 : vector<1x32x32xbf16> to vector<32x32xbf16>
      %cst_50 = arith.constant dense<0.000000e+00> : vector<8x32xf32>
      %96 = tpu.matmul %22, %95, %cst_50 {dimension_numbers = #tpu.dot_dimension_numbers<[1], [0], [0], [1], [0, 0, 1, 1], [], []>} : vector<8x32xbf16>, vector<32x32xbf16>, vector<8x32xf32> -> vector<8x32xf32>
      %97 = vector.broadcast %93 : vector<8x1xf32> to vector<8x32xf32>
      %98 = arith.mulf %97, %96 : vector<8x32xf32>
      %99 = arith.addf %92, %98 : vector<8x32xf32>
      %100 = vector.extract_strided_slice %23 {offsets = [0, 11], sizes = [8, 1], strides = [1, 1]} : vector<8x16xf32> to vector<8x1xf32>
      %c11 = arith.constant 11 : index
      %c0_51 = arith.constant 0 : index
      %c0_52 = arith.constant 0 : index
      %101 = vector.load %arg4[%c11, %c0_51, %c0_52] : memref<16x32x32xbf16, #tpu.memory_space<vmem>>, vector<1x32x32xbf16>
      %102 = vector.shape_cast %101 : vector<1x32x32xbf16> to vector<32x32xbf16>
      %cst_53 = arith.constant dense<0.000000e+00> : vector<8x32xf32>
      %103 = tpu.matmul %22, %102, %cst_53 {dimension_numbers = #tpu.dot_dimension_numbers<[1], [0], [0], [1], [0, 0, 1, 1], [], []>} : vector<8x32xbf16>, vector<32x32xbf16>, vector<8x32xf32> -> vector<8x32xf32>
      %104 = vector.broadcast %100 : vector<8x1xf32> to vector<8x32xf32>
      %105 = arith.mulf %104, %103 : vector<8x32xf32>
      %106 = arith.addf %99, %105 : vector<8x32xf32>
      %107 = vector.extract_strided_slice %23 {offsets = [0, 12], sizes = [8, 1], strides = [1, 1]} : vector<8x16xf32> to vector<8x1xf32>
      %c12 = arith.constant 12 : index
      %c0_54 = arith.constant 0 : index
      %c0_55 = arith.constant 0 : index
      %108 = vector.load %arg4[%c12, %c0_54, %c0_55] : memref<16x32x32xbf16, #tpu.memory_space<vmem>>, vector<1x32x32xbf16>
      %109 = vector.shape_cast %108 : vector<1x32x32xbf16> to vector<32x32xbf16>
      %cst_56 = arith.constant dense<0.000000e+00> : vector<8x32xf32>
      %110 = tpu.matmul %22, %109, %cst_56 {dimension_numbers = #tpu.dot_dimension_numbers<[1], [0], [0], [1], [0, 0, 1, 1], [], []>} : vector<8x32xbf16>, vector<32x32xbf16>, vector<8x32xf32> -> vector<8x32xf32>
      %111 = vector.broadcast %107 : vector<8x1xf32> to vector<8x32xf32>
      %112 = arith.mulf %111, %110 : vector<8x32xf32>
      %113 = arith.addf %106, %112 : vector<8x32xf32>
      %114 = vector.extract_strided_slice %23 {offsets = [0, 13], sizes = [8, 1], strides = [1, 1]} : vector<8x16xf32> to vector<8x1xf32>
      %c13 = arith.constant 13 : index
      %c0_57 = arith.constant 0 : index
      %c0_58 = arith.constant 0 : index
      %115 = vector.load %arg4[%c13, %c0_57, %c0_58] : memref<16x32x32xbf16, #tpu.memory_space<vmem>>, vector<1x32x32xbf16>
      %116 = vector.shape_cast %115 : vector<1x32x32xbf16> to vector<32x32xbf16>
      %cst_59 = arith.constant dense<0.000000e+00> : vector<8x32xf32>
      %117 = tpu.matmul %22, %116, %cst_59 {dimension_numbers = #tpu.dot_dimension_numbers<[1], [0], [0], [1], [0, 0, 1, 1], [], []>} : vector<8x32xbf16>, vector<32x32xbf16>, vector<8x32xf32> -> vector<8x32xf32>
      %118 = vector.broadcast %114 : vector<8x1xf32> to vector<8x32xf32>
      %119 = arith.mulf %118, %117 : vector<8x32xf32>
      %120 = arith.addf %113, %119 : vector<8x32xf32>
      %121 = vector.extract_strided_slice %23 {offsets = [0, 14], sizes = [8, 1], strides = [1, 1]} : vector<8x16xf32> to vector<8x1xf32>
      %c14 = arith.constant 14 : index
      %c0_60 = arith.constant 0 : index
      %c0_61 = arith.constant 0 : index
      %122 = vector.load %arg4[%c14, %c0_60, %c0_61] : memref<16x32x32xbf16, #tpu.memory_space<vmem>>, vector<1x32x32xbf16>
      %123 = vector.shape_cast %122 : vector<1x32x32xbf16> to vector<32x32xbf16>
      %cst_62 = arith.constant dense<0.000000e+00> : vector<8x32xf32>
      %124 = tpu.matmul %22, %123, %cst_62 {dimension_numbers = #tpu.dot_dimension_numbers<[1], [0], [0], [1], [0, 0, 1, 1], [], []>} : vector<8x32xbf16>, vector<32x32xbf16>, vector<8x32xf32> -> vector<8x32xf32>
      %125 = vector.broadcast %121 : vector<8x1xf32> to vector<8x32xf32>
      %126 = arith.mulf %125, %124 : vector<8x32xf32>
      %127 = arith.addf %120, %126 : vector<8x32xf32>
      %128 = vector.extract_strided_slice %23 {offsets = [0, 15], sizes = [8, 1], strides = [1, 1]} : vector<8x16xf32> to vector<8x1xf32>
      %c15 = arith.constant 15 : index
      %c0_63 = arith.constant 0 : index
      %c0_64 = arith.constant 0 : index
      %129 = vector.load %arg4[%c15, %c0_63, %c0_64] : memref<16x32x32xbf16, #tpu.memory_space<vmem>>, vector<1x32x32xbf16>
      %130 = vector.shape_cast %129 : vector<1x32x32xbf16> to vector<32x32xbf16>
      %cst_65 = arith.constant dense<0.000000e+00> : vector<8x32xf32>
      %131 = tpu.matmul %22, %130, %cst_65 {dimension_numbers = #tpu.dot_dimension_numbers<[1], [0], [0], [1], [0, 0, 1, 1], [], []>} : vector<8x32xbf16>, vector<32x32xbf16>, vector<8x32xf32> -> vector<8x32xf32>
      %132 = vector.broadcast %128 : vector<8x1xf32> to vector<8x32xf32>
      %133 = arith.mulf %132, %131 : vector<8x32xf32>
      %134 = arith.addf %127, %133 : vector<8x32xf32>
      %c0_66 = arith.constant 0 : index
      %c0_67 = arith.constant 0 : index
      %135 = vector.load %arg9[%c0_66, %c0_67] : memref<1x32xf32, #tpu.memory_space<vmem>>, vector<1x32xf32>
      %136 = vector.broadcast %135 : vector<1x32xf32> to vector<8x32xf32>
      %137 = arith.mulf %134, %136 : vector<8x32xf32>
      %c0_68 = arith.constant 0 : index
      %c0_69 = arith.constant 0 : index
      %138 = vector.load %arg10[%c0_68, %c0_69] : memref<1x32xf32, #tpu.memory_space<vmem>>, vector<1x32xf32>
      %139 = vector.broadcast %138 : vector<1x32xf32> to vector<8x32xf32>
      %140 = arith.addf %137, %139 : vector<8x32xf32>
      %c0_70 = arith.constant 0 : index
      %c0_71 = arith.constant 0 : index
      %141 = vector.load %arg11[%c0_70, %c0_71] : memref<1x1xf32, #tpu.memory_space<vmem>>, vector<1x1xf32>
      %142 = vector.extract %141[0, 0] : f32 from vector<1x1xf32>
      %cst_72 = arith.constant 0.000000e+00 : f32
      %143 = vector.broadcast %cst_72 : f32 to vector<8x32xf32>
      %144 = arith.cmpf oge, %140, %143 : vector<8x32xf32>
      %145 = vector.broadcast %142 : f32 to vector<8x32xf32>
      %146 = arith.mulf %145, %140 : vector<8x32xf32>
      %147 = arith.select %144, %140, %146 : vector<8x32xi1>, vector<8x32xf32>
      %148 = arith.truncf %147 : vector<8x32xf32> to vector<8x32xbf16>
      %c0_73 = arith.constant 0 : index
      %c0_74 = arith.constant 0 : index
      %149 = vector.load %arg13[%c0_73, %c0_74] : memref<8x32xbf16, #tpu.memory_space<vmem>>, vector<8x32xbf16>
      tpu.vector_store %arg13[%c0_73, %c0_74], %148 {strides = array<i32>} : memref<8x32xbf16, #tpu.memory_space<vmem>>, vector<8x32xbf16>,
    } else {
    }
    %c0 = arith.constant 0 : index
    %c0_1 = arith.constant 0 : index
    %3 = vector.load %arg13[%c0, %c0_1] : memref<8x32xbf16, #tpu.memory_space<vmem>>, vector<8x32xbf16>
    %c0_2 = arith.constant 0 : index
    %c0_3 = arith.constant 0 : index
    %4 = vector.load %arg5[%c0_2, %c0_3] : memref<128x32xbf16, #tpu.memory_space<vmem>>, vector<128x32xbf16>
    %cst = arith.constant dense<0.000000e+00> : vector<8x128xf32>
    %5 = tpu.matmul %3, %4, %cst {dimension_numbers = #tpu.dot_dimension_numbers<[1], [1], [0], [0], [0, 0, 1, 0], [], []>} : vector<8x32xbf16>, vector<128x32xbf16>, vector<8x128xf32> -> vector<8x128xf32>
    %c0_4 = arith.constant 0 : index
    %c0_5 = arith.constant 0 : index
    %6 = vector.load %arg6[%c0_4, %c0_5] : memref<1x128xf32, #tpu.memory_space<vmem>>, vector<1x128xf32>
    %7 = vector.broadcast %6 : vector<1x128xf32> to vector<8x128xf32>
    %8 = arith.addf %5, %7 : vector<8x128xf32>
    %9 = arith.negf %8 : vector<8x128xf32>
    %10 = math.exp %9 : vector<8x128xf32>
    %cst_6 = arith.constant 1.000000e+00 : f32
    %11 = vector.broadcast %cst_6 : f32 to vector<8x128xf32>
    %12 = arith.addf %11, %10 : vector<8x128xf32>
    %13 = arith.divf %11, %12 : vector<8x128xf32>
    %c0_7 = arith.constant 0 : index
    %c0_8 = arith.constant 0 : index
    %14 = vector.load %arg12[%c0_7, %c0_8] : memref<8x128xf32, #tpu.memory_space<vmem>>, vector<8x128xf32>
    tpu.vector_store %arg12[%c0_7, %c0_8], %13 {strides = array<i32>} : memref<8x128xf32, #tpu.memory_space<vmem>>, vector<8x128xf32>,
    return
  }
  func.func @transform_0(%arg0: i32, %arg1: i32) -> (i32, i32) {
    %c0_i32 = arith.constant 0 : i32
    %c0_i32_0 = arith.constant 0 : i32
    return %arg0, %c0_i32 : i32, i32
  }
  func.func @transform_1(%arg0: i32, %arg1: i32) -> (i32, i32) {
    %c0_i32 = arith.constant 0 : i32
    %c0_i32_0 = arith.constant 0 : i32
    return %arg0, %c0_i32 : i32, i32
  }
  func.func @transform_2(%arg0: i32, %arg1: i32) -> (i32, i32, i32) {
    %c0_i32 = arith.constant 0 : i32
    %c0_i32_0 = arith.constant 0 : i32
    %c0_i32_1 = arith.constant 0 : i32
    %c0_i32_2 = arith.constant 0 : i32
    return %c0_i32, %c0_i32_0, %c0_i32_1 : i32, i32, i32
  }
  func.func @transform_3(%arg0: i32, %arg1: i32) -> (i32, i32) {
    %c0_i32 = arith.constant 0 : i32
    %c0_i32_0 = arith.constant 0 : i32
    return %arg1, %c0_i32 : i32, i32
  }
  func.func @transform_4(%arg0: i32, %arg1: i32) -> (i32, i32) {
    %c0_i32 = arith.constant 0 : i32
    %c0_i32_0 = arith.constant 0 : i32
    return %c0_i32, %arg1 : i32, i32
  }
  func.func @transform_5(%arg0: i32, %arg1: i32) -> (i32, i32) {
    %c0_i32 = arith.constant 0 : i32
    %c0_i32_0 = arith.constant 0 : i32
    %c0_i32_1 = arith.constant 0 : i32
    return %c0_i32, %c0_i32_0 : i32, i32
  }
  func.func @transform_6(%arg0: i32, %arg1: i32) -> (i32, i32) {
    %c0_i32 = arith.constant 0 : i32
    %c0_i32_0 = arith.constant 0 : i32
    %c0_i32_1 = arith.constant 0 : i32
    return %c0_i32, %c0_i32_0 : i32, i32
  }
  func.func @transform_7(%arg0: i32, %arg1: i32) -> (i32, i32) {
    %c0_i32 = arith.constant 0 : i32
    %c0_i32_0 = arith.constant 0 : i32
    %c0_i32_1 = arith.constant 0 : i32
    return %c0_i32, %c0_i32_0 : i32, i32
  }
  func.func @transform_8(%arg0: i32, %arg1: i32) -> (i32, i32) {
    %c0_i32 = arith.constant 0 : i32
    %c0_i32_0 = arith.constant 0 : i32
    %c0_i32_1 = arith.constant 0 : i32
    return %c0_i32, %c0_i32_0 : i32, i32
  }
  func.func @transform_9(%arg0: i32, %arg1: i32) -> (i32, i32) {
    %c0_i32 = arith.constant 0 : i32
    %c0_i32_0 = arith.constant 0 : i32
    %c0_i32_1 = arith.constant 0 : i32
    return %c0_i32, %c0_i32_0 : i32, i32
  }
  func.func @transform_10(%arg0: i32, %arg1: i32) -> (i32, i32) {
    %c0_i32 = arith.constant 0 : i32
    return %arg0, %arg1 : i32, i32
  }
}

</mosaic_0001>

<bundles_post_ra>
// kernel: tpu_custom_call.1
= control target key start
LH: loop header
LB: loop body
LE: loop exit
PB: predicated region body
PF: predicated region fallthrough
CT: control target
= control target key end

     0   :  { %s1941_s0 = inlined_call_operand.vmem [shape: f32[8,32], index: 0, kind: input, shape index: {}]   ;;  %s1942_s1 = inlined_call_operand.vmem [shape: f32[8,16], index: 1, kind: input, shape index: {}]   ;;  %s1943_s2 = inlined_call_operand.hbm [shape: bf16[16,32,32], index: 2, kind: input, shape index: {}]   ;;  %s1944_s3 = inlined_call_operand.vmem [shape: bf16[128,32], index: 3, kind: input, shape index: {}]   ;;  %s1945_s4 = inlined_call_operand.vmem [shape: f32[1,128], index: 4, kind: input, shape index: {}]   ;;  %s1946_s5 = inlined_call_operand.vmem [shape: f32[1,32], index: 5, kind: input, shape index: {}]   ;;  %s1947_s6 = inlined_call_operand.vmem [shape: f32[1,32], index: 6, kind: input, shape index: {}]   ;;  %s1948_s7 = inlined_call_operand.vmem [shape: f32[1,32], index: 7, kind: input, shape index: {}]   ;;  %s1949_s8 = inlined_call_operand.vmem [shape: f32[1,32], index: 8, kind: input, shape index: {}]   ;;  %s1950_s9 = inlined_call_operand.<no memory space> [shape: f32[1,1], index: 9, kind: input, shape index: {}]   ;;  %s1951_s10 = inlined_call_operand.hbm [shape: f32[8,128], index: 10, kind: output, shape index: {}]  }
   0x1   :  { %v15_v0 = vstv %s1950_s9 }
   0x2   :  { %16 = vst [vmem:[#allocation3] sm:$0x1] %v15_v0 }
   0x3   :  { %17 = vsyncpa [#allocation5], 0 }
   0x4   :  { %18 = vsyncpa [#allocation6], 0  ;;  %s1663_s15 = smov [#allocation4]  }
   0x5   :  { %s28_s16 = sshll.u32 %s1663_s15, 4  ;;  %s29_s16 = int_to_ptr.vmem [resolvable:$true] %s28_s16 }
   0x6   :  { %s1627_s17 = scalar_lea.vmem %s29_s16, 4096  ;;  %p1632_p1 = scmp.lt.s32.totalorder %s29_s16, %s29_s16 }
   0x7   :  { %p1628_p0 = scmp.ne.s32.totalorder %s29_s16, %s1627_s17  ;;  %p1633_p2 = scmp.lt.s32.totalorder %s1627_s17, %s1627_s17 }
   0x9   :  { %p1634_p3 = por %p1633_p2, %p1632_p1 }
   0xb   :  { %p1635_p4 = pnand %p1634_p3, %p1628_p0 }
   0xd   :  { %1638 = shalt.err (!%p1635_p4)
}
   0xe   :  { %s1664_s18 = smov 64   ;;  %s1665_s19 = smov 4  }
   0xf   :  { %34 = dma.hbm_to_vmem [thread:$0]  %s1943_s2, 4096, %s29_s16, [#allocation5], %s1664_s18, %s1664_s18, %s1665_s19  }
  0x10   :  { %1659 = dma.done.wait [#allocation5], 4096  }
  0x11   :  { %1660 = vsyncadd [#allocation5], 4294963200  ;;  %v1666_v1 = vmov 0.0   ;;  %vm1667_vm0 = vmmov 0   ;;  %v1668_v2 = vmov 0   ;;  %v1669_v3 = vmov 2  }
  0x12   :  { %1386 = vmatprep.subr.bf16.mxu1 %v1666_v1  ;;  %1390 = vmatprep.mubr.msk.bf16.mxu1 %vm1667_vm0, %v1666_v1  ;;  %v1575_v4 = vld [vmem:[#allocation4 + $0x8] sm:$0xff]   ;;  %v1576_v5 = vld [vmem:[#allocation4] sm:$0xff]   ;;  %v1266_v7 = vld [vmem:[%s1946_s5] ss:$0 sm:$0xff]  ;;  %vm92_vm1 = vcmask 261120   ;;  %v1670_v27 = vmov 1  }
  0x13   :  { %1450 = vmatprep.subr.bf16.mxu0 %v1666_v1  ;;  %1454 = vmatprep.mubr.msk.bf16.mxu0 %vm1667_vm0, %v1666_v1  ;;  %v57_v6 = vld [vmem:[%s1941_s0] sm:$0xff]  ;;  %v1578_v13 = vld [vmem:[#allocation4 + $0x10] sm:$0xff]   ;;  %v1579_v14 = vld [vmem:[#allocation4 + $0x28] sm:$0xff]   ;;  %v1671_v29 = vmov 3   ;;  %v1672_v33 = vmov 4   ;;  %v1673_v35 = vmov 5  }
  0x14   :  { %1558 = vset.pattern.permute.xlu0 %v1668_v2  ;;  %1560 = vset.pattern.permute.xlu1 %v1669_v3  ;;  %v1267_v8 = vld [vmem:[%s1947_s6] ss:$0 sm:$0xff]  ;;  %v65_v9 = vmul.f32 %v1266_v7, %v57_v6  ;;  %v1590_v15 = vld [vmem:[#allocation4 + $0x88] sm:$0xff]   ;;  %v1580_v16 = vld [vmem:[#allocation4 + $0x20] sm:$0xff]   ;;  %v1674_v37 = vmov 6   ;;  %v1675_v38 = vmov 8  }
  0x15   :  { %1387 = vmatpush3.bf16.msra.mxu1 %v1575_v4  ;;  %v1577_v11 = vld [vmem:[#allocation4 + $0x18] sm:$0xff]   ;;  %1451 = vmatpush3.bf16.msra.mxu0 %v1590_v15  ;;  %v1592_v17 = vld [vmem:[#allocation4 + $0x80] sm:$0xff]   ;;  %v1594_v19 = vld [vmem:[#allocation4 + $0xa8] sm:$0xff]   ;;  %v1676_v40 = vmov 7   ;;  %v1677_v42 = vmov 11   ;;  %v1678_v44 = vmov 9  }
  0x16   :  { %1388 = vmatprep.subr.bf16.mxu1 %v1666_v1  ;;  %v73_v10 = vadd.f32 %v1267_v8, %v65_v9  ;;  %1452 = vmatprep.subr.bf16.mxu0 %v1666_v1  ;;  %v1581_v18 = vld [vmem:[#allocation4 + $0x38] sm:$0xff]   ;;  %v1582_v20 = vld [vmem:[#allocation4 + $0x30] sm:$0xff]   ;;  %v1596_v22 = vld [vmem:[#allocation4 + $0xa0] sm:$0xff]   ;;  %v1679_v45 = vmov 14   ;;  %v1680_v47 = vmov 10   ;;  %v1681_v49 = vmov 15  }
  0x17   :  { %v1786_v21 = vld [vmem:[%s1942_s1] sm:$0xff]  ;;  %v1583_v23 = vld [vmem:[#allocation4 + $0x48] sm:$0xff]   ;;  %v1586_v31 = vld [vmem:[#allocation4 + $0x50] sm:$0xff]   ;;  %v1682_v50 = vmov 12   ;;  %v1683_v53 = vmov 13   ;;  %vm1110_vm3 = vcmask 257024  }
  0x18   :  { %v1762_v12 = vpack.c.bf16 %v73_v10, %v73_v10  ;;  %138 = vperm.xlu0 %1558, %v1786_v21   ;;  %263 = vperm.xlu1 %1560, %v1786_v21   ;;  %v1598_v24 = vld [vmem:[#allocation4 + $0xc8] sm:$0xff]   ;;  %v1584_v25 = vld [vmem:[#allocation4 + $0x40] sm:$0xff]   ;;  %v1585_v28 = vld [vmem:[#allocation4 + $0x58] sm:$0xff]  }
  0x19   :  { %1389 = vmatpush3.bf16.msra.mxu1 %v1576_v5  ;;  %1453 = vmatpush3.bf16.msra.mxu0 %v1592_v17  ;;  %v1600_v26 = vld [vmem:[#allocation4 + $0xc0] sm:$0xff]   ;;  %v1602_v30 = vld [vmem:[#allocation4 + $0xe8] sm:$0xff]   ;;  %v1589_v39 = vld [vmem:[#allocation4 + $0x78] sm:$0xff]  }
  0x1a   :  { %1394 = vmatprep.subr.bf16.mxu1 %v1666_v1  ;;  %1466 = vmatprep.subr.bf16.mxu0 %v1666_v1  ;;  %v1604_v32 = vld [vmem:[#allocation4 + $0xe0] sm:$0xff]   ;;  %v1587_v34 = vld [vmem:[#allocation4 + $0x68] sm:$0xff]   ;;  %v1591_v41 = vld [vmem:[#allocation4 + $0x70] sm:$0xff]  }
  0x1b   :  { %v1588_v36 = vld [vmem:[#allocation4 + $0x60] sm:$0xff]   ;;  %v1593_v43 = vld [vmem:[#allocation4 + $0x98] sm:$0xff]   ;;  %v1595_v46 = vld [vmem:[#allocation4 + $0x90] sm:$0xff]  }
  0x1c   :  { %1391 = vmatmul.mubr.msk.bf16.vlgmr.msra.gmra.mxu1 %vm92_vm1, %v1762_v12  ;;  %1455 = vmatmul.mubr.msk.bf16.vlgmr.msra.gmra.mxu0 %vm92_vm1, %v1762_v12  ;;  %v1597_v48 = vld [vmem:[#allocation4 + $0xb8] sm:$0xff]   ;;  %v1599_v51 = vld [vmem:[#allocation4 + $0xb0] sm:$0xff]   ;;  %v1609_v62 = vld [vmem:[%s1944_s3 + $0x28] sm:$0xff]  }
  0x1d   :  { %1395 = vmatpush3.bf16.msra.mxu1 %v1577_v11  ;;  %1398 = vmatprep.mubr.msk.bf16.mxu1 %vm1667_vm0, %v1666_v1  ;;  %v1601_v52 = vld [vmem:[#allocation4 + $0xd8] sm:$0xff]   ;;  %v1603_v54 = vld [vmem:[#allocation4 + $0xd0] sm:$0xff]   ;;  %v1196_v63 = vsel %vm92_vm1, %v1609_v62, 0  ;;  %v1613_v7 = vld [vmem:[%s1944_s3 + $0x8] sm:$0xff]  }
  0x1e   :  { %1396 = vmatprep.subr.bf16.mxu1 %v1666_v1  ;;  %1467 = vmatpush3.bf16.msra.mxu0 %v1594_v19  ;;  %v1605_v55 = vld [vmem:[#allocation4 + $0xf8] sm:$0xff]   ;;  %v1606_v56 = vld [vmem:[#allocation4 + $0xf0] sm:$0xff]   ;;  %v1184_v8 = vsel %vm92_vm1, %v1613_v7, 0 }
  0x1f   :  { %1470 = vmatprep.mubr.msk.bf16.mxu0 %vm1667_vm0, %v1666_v1  ;;  %1468 = vmatprep.subr.bf16.mxu0 %v1666_v1  ;;  %v1607_v57 = vld [vmem:[%s1944_s3 + $0x38] sm:$0xff]   ;;  %v1103_v58 = vld [vmem:[#allocation3] sm:$0x1]  ;;  %v1608_v60 = vld [vmem:[%s1944_s3 + $0x30] sm:$0xff]  }
  0x20   :  { %1559 = vset.pattern.permute.xlu0 %v1670_v27  ;;  %1561 = vset.pattern.permute.xlu1 %v1671_v29  ;;  %1534 = vpush %v1103_v58  ;;  %v1202_v59 = vsel %vm92_vm1, %v1607_v57, 0  ;;  %v1199_v61 = vsel %vm92_vm1, %v1608_v60, 0  ;;  %v1610_v0 = vld [vmem:[%s1944_s3 + $0x20] sm:$0xff]   ;;  %v1611_v3 = vld [vmem:[%s1944_s3 + $0x18] sm:$0xff]   ;;  %v1612_v5 = vld [vmem:[%s1944_s3 + $0x10] sm:$0xff]  }
  0x21   :  { %1397 = vmatpush3.bf16.msra.mxu1 %v1578_v13  ;;  %200 = vperm.xlu0 %1559, %v1786_v21   ;;  %v1193_v2 = vsel %vm92_vm1, %v1610_v0, 0  ;;  %v1190_v4 = vsel %vm92_vm1, %v1611_v3, 0  ;;  %v1187_v6 = vsel %vm92_vm1, %v1612_v5, 0  ;;  %v1614_v9 = vld [vmem:[%s1944_s3] sm:$0xff]  }
  0x22   :  { %1402 = vmatprep.subr.bf16.mxu1 %v1666_v1  ;;  %1469 = vmatpush3.bf16.msra.mxu0 %v1596_v22  ;;  %v1181_v10 = vsel %vm92_vm1, %v1614_v9, 0 }
  0x23   :  { %1482 = vmatprep.subr.bf16.mxu0 %v1666_v1  ;;  %326 = vperm.xlu1 %1561, %v1786_v21  }
  0x24   :  { %1399 = vmatmul.mubr.msk.bf16.vlgmr.msra.gmra.mxu1 %vm92_vm1, %v1762_v12 }
  0x25   :  { %1403 = vmatpush3.bf16.msra.mxu1 %v1579_v14  ;;  %1406 = vmatprep.mubr.msk.bf16.mxu1 %vm1667_vm0, %v1666_v1 }
  0x26   :  { %1404 = vmatprep.subr.bf16.mxu1 %v1666_v1  ;;  %1471 = vmatmul.mubr.msk.bf16.vlgmr.msra.gmra.mxu0 %vm92_vm1, %v1762_v12 }
  0x27   :  { %1483 = vmatpush3.bf16.msra.mxu0 %v1598_v24  ;;  %1486 = vmatprep.mubr.msk.bf16.mxu0 %vm1667_vm0, %v1666_v1 }
  0x28   :  { %1484 = vmatprep.subr.bf16.mxu0 %v1666_v1  ;;  %1562 = vset.pattern.permute.xlu1 %v1672_v33 }
  0x29   :  { %1405 = vmatpush3.bf16.msra.mxu1 %v1580_v16  ;;  %389 = vperm.xlu1 %1562, %v1786_v21  }
  0x2a   :  { %1410 = vmatprep.subr.bf16.mxu1 %v1666_v1  ;;  %1563 = vset.pattern.permute.xlu0 %v1673_v35 }
  0x2b   :  { %1485 = vmatpush3.bf16.msra.mxu0 %v1600_v26  ;;  %452 = vperm.xlu0 %1563, %v1786_v21  }
  0x2c   :  { %1407 = vmatmul.mubr.msk.bf16.vlgmr.msra.gmra.mxu1 %vm92_vm1, %v1762_v12  ;;  %1498 = vmatprep.subr.bf16.mxu0 %v1666_v1 }
  0x2d   :  { %1411 = vmatpush3.bf16.msra.mxu1 %v1581_v18  ;;  %1414 = vmatprep.mubr.msk.bf16.mxu1 %vm1667_vm0, %v1666_v1 }
  0x2e   :  { %1412 = vmatprep.subr.bf16.mxu1 %v1666_v1  ;;  %1487 = vmatmul.mubr.msk.bf16.vlgmr.msra.gmra.mxu0 %vm92_vm1, %v1762_v12 }
  0x2f   :  { %1499 = vmatpush3.bf16.msra.mxu0 %v1602_v30  ;;  %1502 = vmatprep.mubr.msk.bf16.mxu0 %vm1667_vm0, %v1666_v1 }
  0x30   :  { %1500 = vmatprep.subr.bf16.mxu0 %v1666_v1  ;;  %1564 = vset.pattern.permute.xlu1 %v1674_v37 }
  0x31   :  { %1413 = vmatpush3.bf16.msra.mxu1 %v1582_v20  ;;  %1566 = vset.pattern.permute.xlu0 %v1675_v38 }
  0x32   :  { %1418 = vmatprep.subr.bf16.mxu1 %v1666_v1  ;;  %515 = vperm.xlu1 %1564, %v1786_v21  }
  0x33   :  { %1501 = vmatpush3.bf16.msra.mxu0 %v1604_v32  ;;  %641 = vperm.xlu0 %1566, %v1786_v21  }
  0x34   :  { %1415 = vmatmul.mubr.msk.bf16.vlgmr.msra.gmra.mxu1 %vm92_vm1, %v1762_v12  ;;  %1514 = vmatprep.subr.bf16.mxu0 %v1666_v1 }
  0x35   :  { %1419 = vmatpush3.bf16.msra.mxu1 %v1583_v23  ;;  %1422 = vmatprep.mubr.msk.bf16.mxu1 %vm1667_vm0, %v1666_v1 }
  0x36   :  { %1420 = vmatprep.subr.bf16.mxu1 %v1666_v1  ;;  %1503 = vmatmul.mubr.msk.bf16.vlgmr.msra.gmra.mxu0 %vm92_vm1, %v1762_v12 }
  0x37   :  { %1530 = vmatprep.mubr.msk.bf16.mxu0 %vm1667_vm0, %v1666_v1  ;;  %1565 = vset.pattern.permute.xlu1 %v1676_v40 }
  0x38   :  { %578 = vperm.xlu1 %1565, %v1786_v21   ;;  %1569 = vset.pattern.permute.xlu0 %v1677_v42 }
  0x39   :  { %1421 = vmatpush3.bf16.msra.mxu1 %v1584_v25  ;;  %830 = vperm.xlu0 %1569, %v1786_v21  }
  0x3a   :  { %1426 = vmatprep.subr.bf16.mxu1 %v1666_v1  ;;  %1515 = vmatpush3.bf16.xpose.msra.mxu0 %v1202_v59 }
  0x3b   :  { %1516 = vmatprep.subr.bf16.mxu0 %v1666_v1 }
  0x3c   :  { %1423 = vmatmul.mubr.msk.bf16.vlgmr.msra.gmra.mxu1 %vm92_vm1, %v1762_v12  ;;  %1567 = vset.pattern.permute.xlu1 %v1678_v44 }
  0x3d   :  { %1427 = vmatpush3.bf16.msra.mxu1 %v1585_v28  ;;  %1430 = vmatprep.mubr.msk.bf16.mxu1 %vm1667_vm0, %v1666_v1 }
  0x3e   :  { %1428 = vmatprep.subr.bf16.mxu1 %v1666_v1  ;;  %704 = vperm.xlu1 %1567, %v1786_v21  }
  0x3f   :  { %1572 = vset.pattern.permute.xlu0 %v1679_v45 }
  0x40   :  { %1019 = vperm.xlu0 %1572, %v1786_v21  }
  0x41   :  { %1429 = vmatpush3.bf16.msra.mxu1 %v1586_v31 }
  0x42   :  { %1434 = vmatprep.subr.bf16.mxu1 %v1666_v1  ;;  %1568 = vset.pattern.permute.xlu1 %v1680_v47 }
  0x43   :  { %767 = vperm.xlu1 %1568, %v1786_v21   ;;  %1517 = vmatpush3.bf16.xpose.msra.mxu0 %v1199_v61 }
  0x44   :  { %1431 = vmatmul.mubr.msk.bf16.vlgmr.msra.gmra.mxu1 %vm92_vm1, %v1762_v12  ;;  %1574 = vset.pattern.permute.xlu0 %v1681_v49 }
  0x45   :  { %1435 = vmatpush3.bf16.msra.mxu1 %v1587_v34  ;;  %1438 = vmatprep.mubr.msk.bf16.mxu1 %vm1667_vm0, %v1666_v1 }
  0x46   :  { %1436 = vmatprep.subr.bf16.mxu1 %v1666_v1  ;;  %1518 = vmatprep.subr.bf16.mxu0 %v1666_v1 }
  0x47   :  { %1570 = vset.pattern.permute.xlu1 %v1682_v50 }
  0x48   :  { %893 = vperm.xlu1 %1570, %v1786_v21  }
  0x49   :  { %1437 = vmatpush3.bf16.msra.mxu1 %v1588_v36 }
  0x4a   :  { %1442 = vmatprep.subr.bf16.mxu1 %v1666_v1 }
  0x4b   :  { %1519 = vmatpush3.bf16.xpose.msra.mxu0 %v1196_v63 }
  0x4c   :  { %1439 = vmatmul.mubr.msk.bf16.vlgmr.msra.gmra.mxu1 %vm92_vm1, %v1762_v12  ;;  %1571 = vset.pattern.permute.xlu1 %v1683_v53 }
  0x4d   :  { %1443 = vmatpush3.bf16.msra.mxu1 %v1589_v39  ;;  %1446 = vmatprep.mubr.msk.bf16.mxu1 %vm1667_vm0, %v1666_v1 }
  0x4e   :  { %1444 = vmatprep.subr.bf16.mxu1 %v1666_v1  ;;  %956 = vperm.xlu1 %1571, %v1786_v21  }
  0x4f   :  { %1520 = vmatprep.subr.bf16.mxu0 %v1666_v1 }
  0x51   :  { %1445 = vmatpush3.bf16.msra.mxu1 %v1591_v41  ;;  %s1535_s21 = spop %1534 }
  0x52   :  { %1458 = vmatprep.subr.bf16.mxu1 %v1666_v1  ;;  %1573 = vset.pattern.permute.xlu1 %v1681_v49 }
  0x53   :  { %1082 = vperm.xlu1 %1573, %v1786_v21   ;;  %1521 = vmatpush3.bf16.xpose.msra.mxu0 %v1193_v2 }
  0x54   :  { %1447 = vmatmul.mubr.msk.bf16.vlgmr.msra.gmra.mxu1 %vm92_vm1, %v1762_v12  ;;  %1522 = vmatprep.subr.bf16.mxu0 %v1666_v1 }
  0x55   :  { %1459 = vmatpush3.bf16.msra.mxu1 %v1593_v43  ;;  %1462 = vmatprep.mubr.msk.bf16.mxu1 %vm1667_vm0, %v1666_v1 }
  0x56   :  { %1460 = vmatprep.subr.bf16.mxu1 %v1666_v1 }
  0x59   :  { %1461 = vmatpush3.bf16.msra.mxu1 %v1595_v46 }
  0x5a   :  { %1474 = vmatprep.subr.bf16.mxu1 %v1666_v1 }
  0x5b   :  { %1523 = vmatpush3.bf16.xpose.msra.mxu0 %v1190_v4 }
  0x5c   :  { %1463 = vmatmul.mubr.msk.bf16.vlgmr.msra.gmra.mxu1 %vm92_vm1, %v1762_v12  ;;  %1524 = vmatprep.subr.bf16.mxu0 %v1666_v1 }
  0x5d   :  { %1475 = vmatpush3.bf16.msra.mxu1 %v1597_v48  ;;  %1478 = vmatprep.mubr.msk.bf16.mxu1 %vm1667_vm0, %v1666_v1 }
  0x5e   :  { %1476 = vmatprep.subr.bf16.mxu1 %v1666_v1 }
  0x61   :  { %1477 = vmatpush3.bf16.msra.mxu1 %v1599_v51 }
  0x62   :  { %1490 = vmatprep.subr.bf16.mxu1 %v1666_v1 }
  0x63   :  { %1525 = vmatpush3.bf16.xpose.msra.mxu0 %v1187_v6 }
  0x64   :  { %1479 = vmatmul.mubr.msk.bf16.vlgmr.msra.gmra.mxu1 %vm92_vm1, %v1762_v12  ;;  %1526 = vmatprep.subr.bf16.mxu0 %v1666_v1 }
  0x65   :  { %1491 = vmatpush3.bf16.msra.mxu1 %v1601_v52  ;;  %1494 = vmatprep.mubr.msk.bf16.mxu1 %vm1667_vm0, %v1666_v1 }
  0x66   :  { %1492 = vmatprep.subr.bf16.mxu1 %v1666_v1 }
  0x69   :  { %1493 = vmatpush3.bf16.msra.mxu1 %v1603_v54 }
  0x6a   :  { %1506 = vmatprep.subr.bf16.mxu1 %v1666_v1 }
  0x6b   :  { %1527 = vmatpush3.bf16.xpose.msra.mxu0 %v1184_v8 }
  0x6c   :  { %1495 = vmatmul.mubr.msk.bf16.vlgmr.msra.gmra.mxu1 %vm92_vm1, %v1762_v12  ;;  %1528 = vmatprep.subr.bf16.mxu0 %v1666_v1 }
  0x6d   :  { %1507 = vmatpush3.bf16.msra.mxu1 %v1605_v55  ;;  %1510 = vmatprep.mubr.msk.bf16.mxu1 %vm1667_vm0, %v1666_v1 }
  0x6e   :  { %1508 = vmatprep.subr.bf16.mxu1 %v1666_v1 }
  0x71   :  { %1509 = vmatpush3.bf16.msra.mxu1 %v1606_v56 }
  0x73   :  { %1529 = vmatpush3.bf16.xpose.msra.mxu0 %v1181_v10 }
  0x74   :  { %1511 = vmatmul.mubr.msk.bf16.vlgmr.msra.gmra.mxu1 %vm92_vm1, %v1762_v12 }
  0x93   :  { %v139_v45 = vpop.permute.xlu0 %138  ;;  %v264_v46 = vpop.permute.xlu1 %263 }
  0x9c   :  { %v201_v51 = vpop.permute.xlu0 %200 }
  0x9e   :  { %v327_v52 = vpop.permute.xlu1 %326 }
  0xa4   :  { %v390_v57 = vpop.permute.xlu1 %389 }
  0xa6   :  { %v453_v0 = vpop.permute.xlu0 %452 }
  0xad   :  { %v516_v2 = vpop.permute.xlu1 %515 }
  0xb3   :  { %v579_v9 = vpop.permute.xlu1 %578 }
  0xdc   :  { %v130_v11 = vpop.f32.mrf.mxu1  ;;  %v1916_v21 = vpop.f32.mrf.mxu0 }
  0xdd   :  { %v141_v59 = vmul.f32 %v139_v45, %v130_v11  ;;  %v642_v11 = vpop.permute.xlu0 %641 }
  0xde   :  { %v1392_v12 = vpop.f32.mrf.mxu1  ;;  %v1456_v22 = vpop.f32.mrf.mxu0 }
  0xdf   :  { %v644_v22 = vmul.f32 %v642_v11, %v1916_v21 }
  0xe0   :  { %v133_v13 = vpop.f32.mrf.mxu1  ;;  %v637_v24 = vpop.f32.mrf.mxu0 }
  0xe2   :  { %v1393_v14 = vpop.f32.mrf.mxu1  ;;  %v1457_v26 = vpop.f32.mrf.mxu0 }
  0xe4   :  { %v193_v15 = vpop.f32.mrf.mxu1 }
  0xe5   :  { %v203_v56 = vmul.f32 %v201_v51, %v193_v15 }
  0xe6   :  { %v1400_v16 = vpop.f32.mrf.mxu1  ;;  %v1918_v28 = vpop.f32.mrf.mxu0 }
  0xe7   :  { %v204_v62 = vadd.f32 %v203_v56, %v141_v59 }
  0xe8   :  { %v196_v17 = vpop.f32.mrf.mxu1  ;;  %v1472_v30 = vpop.f32.mrf.mxu0 }
  0xe9   :  { %v705_v17 = vpop.permute.xlu1 %704 }
  0xea   :  { %v1401_v18 = vpop.f32.mrf.mxu1  ;;  %v763_v32 = vpop.f32.mrf.mxu0 }
  0xec   :  { %v256_v19 = vpop.f32.mrf.mxu1  ;;  %v1473_v34 = vpop.f32.mrf.mxu0 }
  0xed   :  { %v266_v60 = vmul.f32 %v264_v46, %v256_v19 }
  0xee   :  { %v1408_v20 = vpop.f32.mrf.mxu1  ;;  %v1920_v36 = vpop.f32.mrf.mxu0 }
  0xef   :  { %v267_v4 = vadd.f32 %v266_v60, %v204_v62 }
  0xf0   :  { %v259_v1 = vpop.f32.mrf.mxu1  ;;  %v1488_v38 = vpop.f32.mrf.mxu0 }
  0xf2   :  { %v1409_v23 = vpop.f32.mrf.mxu1  ;;  %v889_v40 = vpop.f32.mrf.mxu0 }
  0xf4   :  { %v319_v25 = vpop.f32.mrf.mxu1  ;;  %v1489_v42 = vpop.f32.mrf.mxu0 }
  0xf5   :  { %v329_v63 = vmul.f32 %v327_v52, %v319_v25  ;;  %v768_v25 = vpop.permute.xlu1 %767 }
  0xf6   :  { %v1416_v27 = vpop.f32.mrf.mxu1  ;;  %v1922_v44 = vpop.f32.mrf.mxu0  ;;  %v770_v32 = vmul.f32 %v768_v25, %v1918_v28 }
  0xf7   :  { %v330_v7 = vadd.f32 %v329_v63, %v267_v4 }
  0xf8   :  { %v322_v29 = vpop.f32.mrf.mxu1  ;;  %v1504_v48 = vpop.f32.mrf.mxu0 }
  0xf9   :  { %v831_v29 = vpop.permute.xlu0 %830 }
  0xfa   :  { %v1417_v31 = vpop.f32.mrf.mxu1  ;;  %v1015_v50 = vpop.f32.mrf.mxu0 }
  0xfc   :  { %v382_v33 = vpop.f32.mrf.mxu1  ;;  %v1505_v54 = vpop.f32.mrf.mxu0 }
  0xfd   :  { %v392_v5 = vmul.f32 %v390_v57, %v382_v33  ;;  %v894_v33 = vpop.permute.xlu1 %893  ;;  %v1020_v45 = vpop.permute.xlu0 %1019 }
  0xfe   :  { %v1424_v35 = vpop.f32.mrf.mxu1  ;;  %v896_v21 = vmul.f32 %v894_v33, %v1920_v36  ;;  %v1022_v50 = vmul.f32 %v1020_v45, %v1922_v44  ;;  %v1106_v44 = vstv %s1535_s21 }
  0xff   :  { %v393_v12 = vadd.f32 %v392_v5, %v330_v7 }
 0x100   :  { %v385_v37 = vpop.f32.mrf.mxu1 }
 0x101   :  { %v957_v40 = vpop.permute.xlu1 %956 }
 0x102   :  { %v1425_v39 = vpop.f32.mrf.mxu1 }
 0x104   :  { %v445_v41 = vpop.f32.mrf.mxu1 }
 0x105   :  { %v455_v8 = vmul.f32 %v453_v0, %v445_v41  ;;  %v1083_v51 = vpop.permute.xlu1 %1082 }
 0x106   :  { %v1432_v43 = vpop.f32.mrf.mxu1 }
 0x107   :  { %v456_v15 = vadd.f32 %v455_v8, %v393_v12 }
 0x108   :  { %v448_v47 = vpop.f32.mrf.mxu1 }
 0x10a   :  { %v1433_v49 = vpop.f32.mrf.mxu1 }
 0x10c   :  { %v508_v53 = vpop.f32.mrf.mxu1 }
 0x10d   :  { %v518_v13 = vmul.f32 %v516_v2, %v508_v53 }
 0x10e   :  { %v1440_v55 = vpop.f32.mrf.mxu1 }
 0x10f   :  { %v519_v19 = vadd.f32 %v518_v13, %v456_v15  ;;  %v1316_v55 = vld [vmem:[%s1948_s7] ss:$0 sm:$0xff] }
 0x110   :  { %v511_v58 = vpop.f32.mrf.mxu1 }
 0x111   :  { %v1317_v58 = vld [vmem:[%s1949_s8] ss:$0 sm:$0xff]  ;;  %s1684_s8 = smov [#allocation7]  }
 0x112   :  { %v1441_v61 = vpop.f32.mrf.mxu1  ;;  %s1257_s23 = sshll.u32 %s1684_s8, 4  ;;  %s1258_s23 = int_to_ptr.vmem [resolvable:$true] %s1257_s23 }
 0x113   :  { %s1639_s24 = scalar_lea.vmem %s1258_s23, 128  ;;  %p1644_p6 = scmp.lt.s32.totalorder %s1258_s23, %s1258_s23 }
 0x114   :  { %v571_v3 = vpop.f32.mrf.mxu1  ;;  %p1640_p5 = scmp.ne.s32.totalorder %s1258_s23, %s1639_s24  ;;  %p1645_p7 = scmp.lt.s32.totalorder %s1639_s24, %s1639_s24 }
 0x115   :  { %v581_v16 = vmul.f32 %v579_v9, %v571_v3  ;;  %v1318_v3 = vld [vmem:[%s1945_s4] ss:$0 sm:$0xff] }
 0x116   :  { %v1448_v6 = vpop.f32.mrf.mxu1  ;;  %p1646_p8 = por %p1645_p7, %p1644_p6 }
 0x117   :  { %v582_v1 = vadd.f32 %v581_v16, %v519_v19 }
 0x118   :  { %v574_v10 = vpop.f32.mrf.mxu1  ;;  %p1647_p9 = pnand %p1646_p8, %p1640_p5 }
 0x119   :  { %v645_v27 = vadd.f32 %v644_v22, %v582_v1 }
 0x11a   :  { %v1449_v14 = vpop.f32.mrf.mxu1 }
 0x11c   :  { %v697_v18 = vpop.f32.mrf.mxu1 }
 0x11d   :  { %v707_v24 = vmul.f32 %v705_v17, %v697_v18 }
 0x11e   :  { %v1464_v20 = vpop.f32.mrf.mxu1 }
 0x11f   :  { %v708_v31 = vadd.f32 %v707_v24, %v645_v27 }
 0x120   :  { %v700_v23 = vpop.f32.mrf.mxu1 }
 0x121   :  { %v771_v38 = vadd.f32 %v770_v32, %v708_v31 }
 0x122   :  { %v1465_v26 = vpop.f32.mrf.mxu1 }
 0x124   :  { %v823_v30 = vpop.f32.mrf.mxu1 }
 0x125   :  { %v833_v35 = vmul.f32 %v831_v29, %v823_v30 }
 0x126   :  { %v1480_v34 = vpop.f32.mrf.mxu1 }
 0x127   :  { %v834_v41 = vadd.f32 %v833_v35, %v771_v38 }
 0x128   :  { %v826_v37 = vpop.f32.mrf.mxu1 }
 0x129   :  { %v897_v47 = vadd.f32 %v896_v21, %v834_v41 }
 0x12a   :  { %v1481_v39 = vpop.f32.mrf.mxu1 }
 0x12c   :  { %v949_v42 = vpop.f32.mrf.mxu1 }
 0x12d   :  { %v959_v43 = vmul.f32 %v957_v40, %v949_v42 }
 0x12e   :  { %v1496_v46 = vpop.f32.mrf.mxu1 }
 0x12f   :  { %v960_v49 = vadd.f32 %v959_v43, %v897_v47 }
 0x130   :  { %v952_v48 = vpop.f32.mrf.mxu1 }
 0x131   :  { %v1023_v53 = vadd.f32 %v1022_v50, %v960_v49 }
 0x132   :  { %v1497_v28 = vpop.f32.mrf.mxu1 }
 0x134   :  { %v1075_v52 = vpop.f32.mrf.mxu1 }
 0x135   :  { %v1085_v54 = vmul.f32 %v1083_v51, %v1075_v52 }
 0x136   :  { %v1512_v56 = vpop.f32.mrf.mxu1 }
 0x137   :  { %v1086_v36 = vadd.f32 %v1085_v54, %v1023_v53 }
 0x138   :  { %v1078_v57 = vpop.f32.mrf.mxu1 }
 0x139   :  { %v1094_v59 = vmul.f32 %v1316_v55, %v1086_v36 }
 0x13a   :  { %v1513_v60 = vpop.f32.mrf.mxu1 }
 0x13b   :  { %v1102_v61 = vadd.f32 %v1317_v58, %v1094_v59 }
 0x13d   :  { %vm1105_vm2 = vcmp.ge.f32.partialorder %v1102_v61, 0.0  ;;  %v1107_v62 = vmul.f32 %v1106_v44, %v1102_v61 }
 0x13f   :  { %v1108_v63 = vsel %vm1105_vm2, %v1102_v61, %v1107_v62 }
 0x140   :  { %v1109_v0 = vpack.c.bf16 %v1108_v63, %v1108_v63 }
 0x142   :  { %1111 = vst.msk [vmem:[#allocation2] sm:$0xf] %vm1110_vm3, %v1109_v0 }
 0x149   :  { %v1112_v2 = vld [vmem:[#allocation2] sm:$0xf] }
 0x14a   :  { %1531 = vmatmul.mubr.msk.bf16.vlgmr.msra.gmra.mxu0 %vm92_vm1, %v1112_v2 }
 0x20a   :  { %v1238_v4 = vpop.f32.mrf.mxu0 }
 0x20b   :  { %v1239_v5 = vadd.f32 %v1318_v3, %v1238_v4 }
 0x20c   :  { %v1532_v6 = vpop.f32.mrf.mxu0 }
 0x20d   :  { %v1328_v7 = vmul.f32 -1.442695, %v1239_v5 }
 0x20e   :  { %v1241_v8 = vpop.f32.mrf.mxu0 }
 0x20f   :  { %1615 = vpow2.f32 %v1328_v7 }
 0x210   :  { %v1533_v9 = vpop.f32.mrf.mxu0 }
 0x21c   :  { %v1616_v10 = vpop.eup %1615 }
 0x21d   :  { %v1247_v12 = vadd.f32 1.0, %v1616_v10 }
 0x21f   :  { %1617 = vrcp.f32 %v1247_v12 }
 0x22c   :  { %v1618_v13 = vpop.eup %1617 }
 0x22d   :  { %1250 = vst [vmem:[#allocation7] sm:$0xff] %v1618_v13 }
 0x22e   :  { %1650 = shalt.err (!%p1647_p9)
}
 0x22f   :  { %1260 = dma.vmem_to_hbm [thread:$0]  %s1258_s23, 128, %s1951_s10, [#allocation6]  }
 0x230   :  { %1661 = dma.done.wait [#allocation6], 128  }
 0x231   :  { %1662 = vsyncadd [#allocation6], 4294967168 }
 0x232   :  { %1264 = vsyncpa [#allocation5], 1 }
 0x233   :  { %1265 = vsyncpa [#allocation6], 1 }

</bundles_post_ra>
